<compile_context>
chip_gen: v5e
topology: v5e:2x2
jax: 0.10.0
libtpu: 0.0.40
codegen_flags: <defaults>
</compile_context>

<pallas_src>
import math
import functools

import jax
import jax.numpy as jnp
from jax import lax
from jax.experimental import pallas as pl
from jax.experimental.pallas import tpu as pltpu


_NEG_INF = -1e30


def _attention_kernel(x_ref, wqkv_ref, bqkv_ref, wo_ref, bo_ref, out_ref,
                      *rest, head_dim, seq_len, vis, approx_recip):
    """Grid = (batch, head).  One step == one (batch, head) pair.

    x_ref     : (1, Sp, H)     VMEM, compute dtype (same block across heads)
    wqkv_ref  : (1, H, 3*hd)   VMEM, compute dtype [wq_h | wk_h | wv_h] (scale in wq)
    bqkv_ref  : (1, 1, 3*hd)   VMEM f32
    wo_ref    : (1, hd, H)     VMEM, compute dtype (W_out rows fed by this head)
    bo_ref    : (1, H)         VMEM f32
    out_ref   : (1, Sp, H)     VMEM, x.dtype (same block across heads -> resident)
    probs_ref : (1, 1, Sp, Sp) VMEM (only when vis=True)
    acc_ref   : (Sp, H)        VMEM f32 scratch (output-projection accumulator)
    """
    if vis:
        probs_ref, acc_ref = rest
    else:
        (acc_ref,) = rest

    h = pl.program_id(1)
    nh = pl.num_programs(1)
    hd = head_dim
    cdt = x_ref.dtype
    Sp = x_ref.shape[1]

    @pl.when(h == 0)
    def _():
        # Initialise the output accumulator with the output-projection bias.
        acc_ref[...] = jnp.broadcast_to(bo_ref[...], acc_ref.shape)

    x = x_ref[0]                                             # (Sp, H)

    # Per-head QKV projection; summed over the head grid it equals the fused
    # (H, 3H) projection, with f32 MXU accumulation.
    qkv = jnp.dot(x, wqkv_ref[0], preferred_element_type=jnp.float32)
    qkv = qkv + bqkv_ref[0]                                  # (Sp, 3*hd), f32

    q = qkv[:, 0 * hd:1 * hd].astype(cdt)                    # 1/sqrt(hd) folded into W_q/b_q
    k = qkv[:, 1 * hd:2 * hd].astype(cdt)
    v = qkv[:, 2 * hd:3 * hd].astype(cdt)

    scores = jnp.dot(q, k.T, preferred_element_type=jnp.float32)   # (Sp, Sp)

    if seq_len < Sp:
        # Mask padded key columns before softmax (padded query rows are sliced
        # off in the wrapper).
        key_ids = lax.broadcasted_iota(jnp.int32, scores.shape, 1)
        scores = jnp.where(key_ids < seq_len, scores, _NEG_INF)

    # Numerically-stable softmax in f32 (keeps the VPU path native on v5e too).
    scores = scores - jnp.max(scores, axis=-1, keepdims=True)
    e = jnp.exp(scores)
    denom = jnp.sum(e, axis=-1, keepdims=True)
    if vis or not approx_recip:
        probs = e / denom                          # exact rows-sum-to-1 when emitted
    else:
        probs = e * pl.reciprocal(denom, approx=True)   # EUP slot, ~free

    if vis:
        probs_ref[0, 0] = probs.astype(probs_ref.dtype)

    # Per-head context and its contribution to the output projection.
    ctx = jnp.dot(probs.astype(cdt), v, preferred_element_type=jnp.float32)   # (Sp, hd)
    acc_ref[...] += jnp.dot(ctx.astype(cdt), wo_ref[0],
                            preferred_element_type=jnp.float32)

    @pl.when(h == nh - 1)
    def _():
        out_ref[0] = acc_ref[...].astype(out_ref.dtype)


def pack_attention_params(params, *, num_heads, compute_dtype=jnp.bfloat16):
    """Pack / cast the weights ONCE (hoisted out of the per-forward path).

    params: dict of (in, out)-layout weights wq/wk/wv/wo and (H,) biases.
    Returns per-head-packed, compute-dtype weights with the softmax scale
    folded into W_q / b_q.
    """
    H = params["wq"].shape[0]
    assert H % num_heads == 0
    hd = H // num_heads
    scale = 1.0 / math.sqrt(hd)

    def heads_w(w):            # (H, H) -> (NH, H, hd)
        return jnp.transpose(w.reshape(H, num_heads, hd), (1, 0, 2))

    def heads_b(b):            # (H,) -> (NH, 1, hd)
        return b.reshape(num_heads, 1, hd)

    wqkv = jnp.concatenate([heads_w(params["wq"] * scale),
                            heads_w(params["wk"]),
                            heads_w(params["wv"])], axis=2)      # (NH, H, 3*hd)
    bqkv = jnp.concatenate([heads_b(params["bq"] * scale),
                            heads_b(params["bk"]),
                            heads_b(params["bv"])], axis=2)      # (NH, 1, 3*hd)
    wo = params["wo"].reshape(num_heads, hd, H)                  # rows h*hd:(h+1)*hd
    bo = params["bo"].reshape(1, H)
    return dict(wqkv=wqkv.astype(compute_dtype),
                bqkv=bqkv.astype(jnp.float32),
                wo=wo.astype(compute_dtype),
                bo=bo.astype(jnp.float32),
                num_heads=num_heads, head_dim=hd,
                compute_dtype=jnp.dtype(compute_dtype))


def _vmem_limit_bytes():
    # Generation-aware VMEM budget: leave more headroom on v7x (64 MiB/TC)
    # than on v5e/v6e (128 MiB).
    try:
        cap = int(pltpu.get_tpu_info().vmem_capacity_bytes)
    except Exception:
        cap = 64 * 1024 * 1024
    return 48 * 1024 * 1024 if cap >= 128 * 1024 * 1024 else 36 * 1024 * 1024


def _pad_seq(S):
    # Lane-dense padding for the (S, S) scores/probs tiles: multiple of 128
    # once S is large enough (ViT's 197 -> 256), otherwise the 8-sublane multiple.
    if S % 128 == 0:
        return S
    if S >= 128:
        return ((S + 127) // 128) * 128
    return ((S + 7) // 8) * 8


def attention_forward(x, packed, *, vis=True, probs_dtype=None):
    """x: (B, S, H).  packed: output of pack_attention_params.

    Returns (attention_output, attention_probs or None), matching the PyTorch
    module's (attention_output, weights) with dropout = identity.
    """
    B, S, H = x.shape
    nh = packed["num_heads"]
    hd = packed["head_dim"]
    cdt = packed["compute_dtype"]
    assert nh * hd == H

    if probs_dtype is None:
        probs_dtype = x.dtype          # knob: bf16 probs halve HBM write traffic

    Sp = _pad_seq(S)
    xc = x.astype(cdt)
    if Sp != S:
        xc = jnp.pad(xc, ((0, 0), (0, Sp - S), (0, 0)))

    approx_recip = (jnp.dtype(cdt) != jnp.dtype(jnp.float32))

    kernel = functools.partial(_attention_kernel, head_dim=hd, seq_len=S,
                               vis=vis, approx_recip=approx_recip)

    in_specs = [
        pl.BlockSpec((1, Sp, H), lambda b, h: (b, 0, 0)),         # x (resident per batch)
        pl.BlockSpec((1, H, 3 * hd), lambda b, h: (h, 0, 0)),     # per-head QKV weights
        pl.BlockSpec((1, 1, 3 * hd), lambda b, h: (h, 0, 0)),     # per-head QKV bias
        pl.BlockSpec((1, hd, H), lambda b, h: (h, 0, 0)),         # per-head out-proj rows
        pl.BlockSpec((1, H), lambda b, h: (0, 0)),                # out-proj bias
    ]
    out_spec = pl.BlockSpec((1, Sp, H), lambda b, h: (b, 0, 0))   # resident across heads

    if vis:
        out_shape = (jax.ShapeDtypeStruct((B, Sp, H), x.dtype),
                     jax.ShapeDtypeStruct((B, nh, Sp, Sp), probs_dtype))
        out_specs = (out_spec,
                     pl.BlockSpec((1, 1, Sp, Sp), lambda b, h: (b, h, 0, 0)))
    else:
        out_shape = jax.ShapeDtypeStruct((B, Sp, H), x.dtype)
        out_specs = out_spec

    result = pl.pallas_call(
        kernel,
        out_shape=out_shape,
        grid_spec=pltpu.PrefetchScalarGridSpec(
            num_scalar_prefetch=0,
            grid=(B, nh),
            in_specs=in_specs,
            out_specs=out_specs,
            scratch_shapes=[pltpu.VMEM((Sp, H), jnp.float32)],
        ),
        compiler_params=pltpu.CompilerParams(
            # Batch steps are independent (megacore-shardable); the head axis
            # carries the output-projection accumulator -> reduction.
            dimension_semantics=("parallel", "arbitrary"),
            vmem_limit_bytes=_vmem_limit_bytes(),
        ),
    )(xc, packed["wqkv"], packed["bqkv"], packed["wo"], packed["bo"])

    if vis:
        out, probs = result
    else:
        out, probs = result, None

    if Sp != S:
        out = out[:, :S, :]
        if probs is not None:
            probs = probs[:, :, :S, :S]
    return out, probs


def _reference(x, params, num_heads):
    """Pure-JAX reference mirroring the PyTorch forward (dropout = identity)."""
    B, S, H = x.shape
    hd = H // num_heads

    def lin(x, w, b):
        return x @ w + b

    q = lin(x, params["wq"], params["bq"]).reshape(B, S, num_heads, hd).transpose(0, 2, 1, 3)
    k = lin(x, params["wk"], params["bk"]).reshape(B, S, num_heads, hd).transpose(0, 2, 1, 3)
    v = lin(x, params["wv"], params["bv"]).reshape(B, S, num_heads, hd).transpose(0, 2, 1, 3)

    scores = jnp.einsum("bhqd,bhkd->bhqk", q, k) / math.sqrt(hd)
    probs = jax.nn.softmax(scores, axis=-1)
    ctx = jnp.einsum("bhqk,bhkd->bhqd", probs, v)
    ctx = ctx.transpose(0, 2, 1, 3).reshape(B, S, H)
    out = lin(ctx, params["wo"], params["bo"])
    return out, probs


if __name__ == "__main__":
    B, S, H = 2, 8, 32
    NUM_HEADS = 4

    key = jax.random.PRNGKey(0)
    keys = jax.random.split(key, 10)
    x = jax.random.normal(keys[0], (B, S, H), dtype=jnp.float32)

    def init_linear(kw, kb, fan_in, fan_out):
        bound = 1.0 / math.sqrt(fan_in)
        w = jax.random.uniform(kw, (fan_in, fan_out), jnp.float32, -bound, bound)
        b = jax.random.uniform(kb, (fan_out,), jnp.float32, -bound, bound)
        return w, b

    wq, bq = init_linear(keys[1], keys[2], H, H)
    wk, bk = init_linear(keys[3], keys[4], H, H)
    wv, bv = init_linear(keys[5], keys[6], H, H)
    wo, bo = init_linear(keys[7], keys[8], H, H)
    params = dict(wq=wq, bq=bq, wk=wk, bk=bk, wv=wv, bv=bv, wo=wo, bo=bo)

    ref_out, ref_probs = _reference(x, params, NUM_HEADS)

    # Weights are packed ONCE (not per forward call).
    packed_f32 = pack_attention_params(params, num_heads=NUM_HEADS,
                                       compute_dtype=jnp.float32)
    packed_bf16 = pack_attention_params(params, num_heads=NUM_HEADS,
                                        compute_dtype=jnp.bfloat16)

    # 1) Strict numerics: f32 compute path, probs requested (vis=True).
    out32, probs32 = attention_forward(x, packed_f32, vis=True,
                                       probs_dtype=jnp.float32)
    out32, probs32 = jax.block_until_ready((out32, probs32))
    assert jnp.allclose(out32, ref_out, atol=1e-4, rtol=1e-4), "f32 output mismatch"
    assert jnp.allclose(probs32, ref_probs, atol=1e-4, rtol=1e-4), "f32 probs mismatch"

    # 2) Performance path: bf16 operands with f32 accumulation, bf16 probs.
    out16, probs16 = attention_forward(x, packed_bf16, vis=True,
                                       probs_dtype=jnp.bfloat16)
    out16, probs16 = jax.block_until_ready((out16, probs16))
    assert jnp.allclose(out16, ref_out, atol=5e-2, rtol=5e-2), "bf16 output mismatch"
    assert jnp.allclose(probs16.astype(jnp.float32), ref_probs,
                        atol=2e-2, rtol=2e-2), "bf16 probs mismatch"

    # 3) vis=False path: no attention-probs output (no (B,NH,S,S) HBM traffic).
    out_nv, probs_nv = attention_forward(x, packed_bf16, vis=False)
    out_nv = jax.block_until_ready(out_nv)
    assert probs_nv is None
    assert jnp.allclose(out_nv, ref_out, atol=5e-2, rtol=5e-2), "vis=False output mismatch"

    # 4) Padded-sequence path (S not a sublane multiple) exercises the key mask.
    S2 = 12
    x2 = jax.random.normal(keys[9], (B, S2, H), dtype=jnp.float32)
    ref_out2, ref_probs2 = _reference(x2, params, NUM_HEADS)
    out_p, probs_p = attention_forward(x2, packed_f32, vis=True,
                                       probs_dtype=jnp.float32)
    out_p, probs_p = jax.block_until_ready((out_p, probs_p))
    assert out_p.shape == (B, S2, H) and probs_p.shape == (B, NUM_HEADS, S2, S2)
    assert jnp.allclose(out_p, ref_out2, atol=1e-4, rtol=1e-4), "padded output mismatch"
    assert jnp.allclose(probs_p, ref_probs2, atol=1e-4, rtol=1e-4), "padded probs mismatch"

    print("KERNEL_OK")
</pallas_src>

<mosaic_0001>
module attributes {stable_mosaic.version = 11 : i64} {
  func.func @_attention_kernel(%arg0: i32, %arg1: i32, %arg2: memref<1x8x32xf32, #tpu.memory_space<vmem>>, %arg3: memref<1x32x24xf32, #tpu.memory_space<vmem>>, %arg4: memref<1x1x24xf32, #tpu.memory_space<vmem>>, %arg5: memref<1x8x32xf32, #tpu.memory_space<vmem>>, %arg6: memref<1x32xf32, #tpu.memory_space<vmem>>, %arg7: memref<1x8x32xf32, #tpu.memory_space<vmem>>, %arg8: memref<1x1x8x8xf32, #tpu.memory_space<vmem>>, %arg9: memref<8x32xf32, #tpu.memory_space<vmem>>) attributes {dimension_semantics = [#tpu.dimension_semantics<parallel>, #tpu.dimension_semantics<arbitrary>], iteration_bounds = array<i64: 2, 4>, scalar_prefetch = 0 : i64, scratch_operands = 1 : i64, tpu.core_type = #tpu.core_type<tc>, window_params = [{transform_indices = @transform_0, window_bounds = array<i64: 1, 8, 32>}, {transform_indices = @transform_1, window_bounds = array<i64: 1, 32, 24>}, {transform_indices = @transform_2, window_bounds = array<i64: 1, 1, 24>}, {transform_indices = @transform_3, window_bounds = array<i64: 1, 8, 32>}, {pipeline_mode = #tpu.pipeline_mode<synchronous>, transform_indices = @transform_4, window_bounds = array<i64: 1, 32>}, {transform_indices = @transform_5, window_bounds = array<i64: 1, 8, 32>}, {transform_indices = @transform_6, window_bounds = array<i64: 1, 1, 8, 8>}]} {
    %c0_i32 = arith.constant 0 : i32
    %0 = arith.cmpi eq, %arg1, %c0_i32 : i32
    %1 = arith.extui %0 : i1 to i32
    %c0_i32_0 = arith.constant 0 : i32
    %2 = arith.cmpi ne, %1, %c0_i32_0 : i32
    scf.if %2 {
      %c0_26 = arith.constant 0 : index
      %c0_27 = arith.constant 0 : index
      %39 = vector.load %arg6[%c0_26, %c0_27] : memref<1x32xf32, #tpu.memory_space<vmem>>, vector<1x32xf32>
      %40 = vector.shape_cast %39 : vector<1x32xf32> to vector<1x32xf32>
      %41 = vector.broadcast %40 : vector<1x32xf32> to vector<8x32xf32>
      %c0_28 = arith.constant 0 : index
      %c0_29 = arith.constant 0 : index
      %42 = vector.load %arg9[%c0_28, %c0_29] : memref<8x32xf32, #tpu.memory_space<vmem>>, vector<8x32xf32>
      tpu.vector_store %arg9[%c0_28, %c0_29], %41 {strides = array<i32>} : memref<8x32xf32, #tpu.memory_space<vmem>>, vector<8x32xf32>,
    } else {
    }
    %c0 = arith.constant 0 : index
    %c0_1 = arith.constant 0 : index
    %c0_2 = arith.constant 0 : index
    %3 = vector.load %arg2[%c0, %c0_1, %c0_2] : memref<1x8x32xf32, #tpu.memory_space<vmem>>, vector<1x8x32xf32>
    %4 = vector.shape_cast %3 : vector<1x8x32xf32> to vector<8x32xf32>
    %c0_3 = arith.constant 0 : index
    %c0_4 = arith.constant 0 : index
    %c0_5 = arith.constant 0 : index
    %5 = vector.load %arg3[%c0_3, %c0_4, %c0_5] : memref<1x32x24xf32, #tpu.memory_space<vmem>>, vector<1x32x24xf32>
    %6 = vector.shape_cast %5 : vector<1x32x24xf32> to vector<32x24xf32>
    %cst = arith.constant dense<0.000000e+00> : vector<8x24xf32>
    %7 = tpu.matmul %4, %6, %cst {dimension_numbers = #tpu.dot_dimension_numbers<[1], [0], [0], [1], [0, 0, 1, 1], [], []>} : vector<8x32xf32>, vector<32x24xf32>, vector<8x24xf32> -> vector<8x24xf32>
    %c0_6 = arith.constant 0 : index
    %c0_7 = arith.constant 0 : index
    %c0_8 = arith.constant 0 : index
    %8 = vector.load %arg4[%c0_6, %c0_7, %c0_8] : memref<1x1x24xf32, #tpu.memory_space<vmem>>, vector<1x1x24xf32>
    %9 = vector.shape_cast %8 : vector<1x1x24xf32> to vector<1x24xf32>
    %10 = vector.broadcast %9 : vector<1x24xf32> to vector<8x24xf32>
    %11 = arith.addf %7, %10 : vector<8x24xf32>
    %12 = vector.extract_strided_slice %11 {offsets = [0, 0], sizes = [8, 8], strides = [1, 1]} : vector<8x24xf32> to vector<8x8xf32>
    %13 = vector.extract_strided_slice %11 {offsets = [0, 8], sizes = [8, 8], strides = [1, 1]} : vector<8x24xf32> to vector<8x8xf32>
    %14 = vector.extract_strided_slice %11 {offsets = [0, 16], sizes = [8, 8], strides = [1, 1]} : vector<8x24xf32> to vector<8x8xf32>
    %15 = tpu.transpose %13, [1, 0] : vector<8x8xf32> -> vector<8x8xf32>
    %cst_9 = arith.constant dense<0.000000e+00> : vector<8x8xf32>
    %16 = tpu.matmul %12, %15, %cst_9 {dimension_numbers = #tpu.dot_dimension_numbers<[1], [0], [0], [1], [0, 0, 1, 1], [], []>} : vector<8x8xf32>, vector<8x8xf32>, vector<8x8xf32> -> vector<8x8xf32>
    %cst_10 = arith.constant dense<0xFF800000> : vector<8xf32>
    %17 = vector.multi_reduction <maximumf>, %16, %cst_10 [1] : vector<8x8xf32> to vector<8xf32>
    %18 = vector.shape_cast %17 : vector<8xf32> to vector<8x1xf32>
    %19 = vector.broadcast %18 : vector<8x1xf32> to vector<8x8xf32>
    %20 = arith.subf %16, %19 : vector<8x8xf32>
    %21 = math.exp %20 : vector<8x8xf32>
    %cst_11 = arith.constant dense<0.000000e+00> : vector<8xf32>
    %22 = vector.multi_reduction <add>, %21, %cst_11 [1] : vector<8x8xf32> to vector<8xf32>
    %23 = vector.shape_cast %22 : vector<8xf32> to vector<8x1xf32>
    %24 = vector.broadcast %23 : vector<8x1xf32> to vector<8x8xf32>
    %25 = arith.divf %21, %24 : vector<8x8xf32>
    %c0_12 = arith.constant 0 : index
    %c0_13 = arith.constant 0 : index
    %c0_14 = arith.constant 0 : index
    %c0_15 = arith.constant 0 : index
    %26 = vector.load %arg8[%c0_12, %c0_13, %c0_14, %c0_15] : memref<1x1x8x8xf32, #tpu.memory_space<vmem>>, vector<1x1x8x8xf32>
    %27 = vector.shape_cast %26 : vector<1x1x8x8xf32> to vector<8x8xf32>
    %28 = vector.shape_cast %25 : vector<8x8xf32> to vector<1x1x8x8xf32>
    tpu.vector_store %arg8[%c0_12, %c0_13, %c0_14, %c0_15], %28 {strides = array<i32>} : memref<1x1x8x8xf32, #tpu.memory_space<vmem>>, vector<1x1x8x8xf32>,
    %cst_16 = arith.constant dense<0.000000e+00> : vector<8x8xf32>
    %29 = tpu.matmul %25, %14, %cst_16 {dimension_numbers = #tpu.dot_dimension_numbers<[1], [0], [0], [1], [0, 0, 1, 1], [], []>} : vector<8x8xf32>, vector<8x8xf32>, vector<8x8xf32> -> vector<8x8xf32>
    %c0_17 = arith.constant 0 : index
    %c0_18 = arith.constant 0 : index
    %30 = vector.load %arg9[%c0_17, %c0_18] : memref<8x32xf32, #tpu.memory_space<vmem>>, vector<8x32xf32>
    %c0_19 = arith.constant 0 : index
    %c0_20 = arith.constant 0 : index
    %c0_21 = arith.constant 0 : index
    %31 = vector.load %arg5[%c0_19, %c0_20, %c0_21] : memref<1x8x32xf32, #tpu.memory_space<vmem>>, vector<1x8x32xf32>
    %32 = vector.shape_cast %31 : vector<1x8x32xf32> to vector<8x32xf32>
    %cst_22 = arith.constant dense<0.000000e+00> : vector<8x32xf32>
    %33 = tpu.matmul %29, %32, %cst_22 {dimension_numbers = #tpu.dot_dimension_numbers<[1], [0], [0], [1], [0, 0, 1, 1], [], []>} : vector<8x8xf32>, vector<8x32xf32>, vector<8x32xf32> -> vector<8x32xf32>
    %34 = arith.addf %30, %33 : vector<8x32xf32>
    %c0_23 = arith.constant 0 : index
    %c0_24 = arith.constant 0 : index
    %35 = vector.load %arg9[%c0_23, %c0_24] : memref<8x32xf32, #tpu.memory_space<vmem>>, vector<8x32xf32>
    tpu.vector_store %arg9[%c0_23, %c0_24], %34 {strides = array<i32>} : memref<8x32xf32, #tpu.memory_space<vmem>>, vector<8x32xf32>,
    %c3_i32 = arith.constant 3 : i32
    %36 = arith.cmpi eq, %arg1, %c3_i32 : i32
    %37 = arith.extui %36 : i1 to i32
    %c0_i32_25 = arith.constant 0 : i32
    %38 = arith.cmpi ne, %37, %c0_i32_25 : i32
    scf.if %38 {
      %c0_26 = arith.constant 0 : index
      %c0_27 = arith.constant 0 : index
      %39 = vector.load %arg9[%c0_26, %c0_27] : memref<8x32xf32, #tpu.memory_space<vmem>>, vector<8x32xf32>
      %c0_28 = arith.constant 0 : index
      %c0_29 = arith.constant 0 : index
      %c0_30 = arith.constant 0 : index
      %40 = vector.load %arg7[%c0_28, %c0_29, %c0_30] : memref<1x8x32xf32, #tpu.memory_space<vmem>>, vector<1x8x32xf32>
      %41 = vector.shape_cast %40 : vector<1x8x32xf32> to vector<8x32xf32>
      %42 = vector.shape_cast %39 : vector<8x32xf32> to vector<1x8x32xf32>
      tpu.vector_store %arg7[%c0_28, %c0_29, %c0_30], %42 {strides = array<i32>} : memref<1x8x32xf32, #tpu.memory_space<vmem>>, vector<1x8x32xf32>,
    } else {
    }
    return
  }
  func.func @transform_0(%arg0: i32, %arg1: i32) -> (i32, i32, i32) {
    %c0_i32 = arith.constant 0 : i32
    %c0_i32_0 = arith.constant 0 : i32
    %c0_i32_1 = arith.constant 0 : i32
    return %arg0, %c0_i32, %c0_i32_0 : i32, i32, i32
  }
  func.func @transform_1(%arg0: i32, %arg1: i32) -> (i32, i32, i32) {
    %c0_i32 = arith.constant 0 : i32
    %c0_i32_0 = arith.constant 0 : i32
    %c0_i32_1 = arith.constant 0 : i32
    return %arg1, %c0_i32, %c0_i32_0 : i32, i32, i32
  }
  func.func @transform_2(%arg0: i32, %arg1: i32) -> (i32, i32, i32) {
    %c0_i32 = arith.constant 0 : i32
    %c0_i32_0 = arith.constant 0 : i32
    %c0_i32_1 = arith.constant 0 : i32
    return %arg1, %c0_i32, %c0_i32_0 : i32, i32, i32
  }
  func.func @transform_3(%arg0: i32, %arg1: i32) -> (i32, i32, i32) {
    %c0_i32 = arith.constant 0 : i32
    %c0_i32_0 = arith.constant 0 : i32
    %c0_i32_1 = arith.constant 0 : i32
    return %arg1, %c0_i32, %c0_i32_0 : i32, i32, i32
  }
  func.func @transform_4(%arg0: i32, %arg1: i32) -> (i32, i32) {
    %c0_i32 = arith.constant 0 : i32
    %c0_i32_0 = arith.constant 0 : i32
    %c0_i32_1 = arith.constant 0 : i32
    return %c0_i32, %c0_i32_0 : i32, i32
  }
  func.func @transform_5(%arg0: i32, %arg1: i32) -> (i32, i32, i32) {
    %c0_i32 = arith.constant 0 : i32
    %c0_i32_0 = arith.constant 0 : i32
    %c0_i32_1 = arith.constant 0 : i32
    return %arg0, %c0_i32, %c0_i32_0 : i32, i32, i32
  }
  func.func @transform_6(%arg0: i32, %arg1: i32) -> (i32, i32, i32, i32) {
    %c0_i32 = arith.constant 0 : i32
    %c0_i32_0 = arith.constant 0 : i32
    %c0_i32_1 = arith.constant 0 : i32
    return %arg0, %arg1, %c0_i32, %c0_i32_0 : i32, i32, i32, i32
  }
}

</mosaic_0001>

<bundles_post_ra>
// kernel: tpu_custom_call.1
= control target key start
LH: loop header
LB: loop body
LE: loop exit
PB: predicated region body
PF: predicated region fallthrough
CT: control target
= control target key end

     0   :  { %s1221_s0 = inlined_call_operand.vmem [shape: f32[2,8,32], index: 0, kind: input, shape index: {}]   ;;  %s1222_s1 = inlined_call_operand.vmem [shape: f32[4,32,24], index: 1, kind: input, shape index: {}]   ;;  %s1223_s2 = inlined_call_operand.vmem [shape: f32[4,1,24], index: 2, kind: input, shape index: {}]   ;;  %s1224_s3 = inlined_call_operand.vmem [shape: f32[4,8,32], index: 3, kind: input, shape index: {}]   ;;  %s1225_s4 = inlined_call_operand.vmem [shape: f32[1,32], index: 4, kind: input, shape index: {}]   ;;  %s1226_s5 = inlined_call_operand.hbm [shape: f32[2,8,32], index: 5, kind: output, shape index: {0}]   ;;  %s1227_s6 = inlined_call_operand.hbm [shape: f32[2,4,8,8], index: 6, kind: output, shape index: {1}]  }
   0x1   :  { %1245 = sst [smem:[#allocation23_spill]] %s1227_s6 }
   0x2   :  { %12 = vsyncpa [#allocation4], 0 }
   0x3   :  { %14 = vsyncpa [#allocation4 + $0x1], 0 }
   0x4   :  { %15 = vsyncpa [#allocation6], 0 }
   0x5   :  { %17 = vsyncpa [#allocation6 + $0x1], 0  ;;  %s976_s21 = smov 0   ;;  %s978_s22 = smov 0  }
   0x6   :  { %s980_s23 = smov 0   ;;  %s982_s24 = smov 0  }
   0x7   :  { %s984_s25 = smov 0   ;;  %s986_s26 = smov 0  }
   0x8   :  { %s988_s27 = smov 0   ;;  %s990_s28 = smov 0  }
   0x9   :  { %s992_s29 = smov 0   ;;  %s994_s30 = smov 0  }
   0xa   :  { %s996_s7 = smov 0  }
   0xb LB: > { %1246 = sst [smem:[#allocation9_spill]] %s897_s21  ;;  %s653_s8 = sadd.s32 4294967295, %s937_s7   ;;  %s937_s7 = sphi %s996_s7, %s23_s7   ;;  %s933_s30 = sphi %s994_s30, %s1282_s30   ;;  %s929_s29 = sphi %s992_s29, %s1288_s29   ;;  %s925_s28 = sphi %s990_s28, %s1280_s28   ;;  %s921_s27 = sphi %s988_s27, %s1279_s27   ;;  %s917_s26 = sphi %s986_s26, %s1278_s26   ;;  %s913_s25 = sphi %s984_s25, %s1287_s25   ;;  %s909_s24 = sphi %s982_s24, %s1286_s24   ;;  %s905_s23 = sphi %s980_s23, %s1285_s23   ;;  %s901_s22 = sphi %s978_s22, %s1284_s22   ;;  %s897_s21 = sphi %s976_s21, %s1283_s21  }
   0xc   : > { %1247 = sst [smem:[#allocation10_spill]] %s905_s23  ;;  %s654_s9 = sadd.s32 4294967294, %s937_s7  }
   0xd   : > { %1248 = sst [smem:[#allocation11_spill]] %s909_s24  ;;  %s32_s10 = sadd.s32 1, %s929_s29 }
   0xe   : > { %1249 = sst [smem:[#allocation12_spill]] %s917_s26  ;;  %s35_s11 = sadd.s32 1, %s933_s30 }
   0xf   : > { %1250 = sst [smem:[#allocation13_spill]] %s929_s29  ;;  %p33_p0 = scmp.ge.s32.totalorder %s32_s10, 4 }
  0x10   : > { %1251 = sst [smem:[#allocation14_spill]] %s933_s30  ;;  %s167_s12 = sadd.s32 1, %s917_s26 }
  0x11   : > { %1252 = sst [smem:[#allocation15_spill]] %s937_s7  ;;  %p177_p1 = scmp.ne.s32.totalorder %s917_s26, %s913_s25 }
  0x12   : > { %p1038_p2 = scmp.eq.s32.totalorder %s653_s8, 7  ;;  %s1290_s10 = smov (%p33_p0, %s32_s10), 0 }
  0x13   : > { %1254 = sst [smem:[#allocation16_spill]] %s1290_s10  ;;  %s1292_s11 = smov (!%p33_p0, %s35_s11), %s933_s30 }
  0x14   : > { %p1047_p3 = por %p1038_p2, %p177_p1  ;;  %p183_p4 = scmp.ne.s32.totalorder %s913_s25, %s909_s24 }
  0x15   : > { %p37_p5 = scmp.ge.s32.totalorder %s1292_s11, 2  ;;  %p1053_p6 = scmp.eq.s32.totalorder %s654_s9, 7 }
  0x16   : > { %s191_s16 = ssub.s32 %s929_s29, %s1290_s10  ;;  %s195_s17 = sadd.s32 1, %s905_s23 }
  0x17   : > { %s1294_s11 = smov (%p37_p5, %s1292_s11), 0  ;;  %p1064_p7 = por %p1053_p6, %p183_p4 }
  0x18   : > { %1257 = sst [smem:[#allocation17_spill]] %s1294_s11  ;;  %p205_p8 = scmp.ne.s32.totalorder %s905_s23, %s901_s22 }
  0x19   : > { %s1258_s18 = scalar_select %p1064_p7, 1, 0 }
  0x1a   : > { %s164_s19 = ssub.s32 %s933_s30, %s1294_s11  ;;  %p211_p9 = scmp.ne.s32.totalorder %s901_s22, %s897_s21 }
  0x1b   : > { %1259 = sst [smem:[#allocation18_spill]] %s1258_s18  ;;  %p165_p10 = scmp.eq.s32.totalorder %s164_s19, 0 }
  0x1c   : > { %s192_s20 = sor.u32 %s191_s16, %s164_s19  ;;  %p1076_p12 = por %p205_p8, %p1038_p2 }
  0x1d   : > { %p193_p11 = scmp.eq.s32.totalorder %s192_s20, 0  ;;  %p1088_p13 = por %p211_p9, %p1053_p6 }
  0x1e   : > { %s1260_s8 = scalar_select %p1076_p12, 1, 0 }
  0x1f   : > { %s1081_s9 = scalar_select %p165_p10, %s917_s26, %s167_s12  }
  0x20   : > { %1261 = sst [smem:[#allocation19_spill]] %s1260_s8  ;;  %p657_p0 = scmp.ge.s32.totalorder %s937_s7, 1 }
  0x21   : > { %1262 = sst [smem:[#allocation20_spill]] %s1081_s9  ;;  %p261_p1 = scmp.lt.s32.totalorder %s937_s7, 9 }
  0x22   : > { %s1084_s10 = scalar_select %p193_p11, %s905_s23, %s195_s17  }
  0x23   : > { %s1264_s29 = scalar_select %p1088_p13, 1, 0 }
  0x24   : > { %1263 = sst [smem:[#allocation21_spill]] %s1084_s10  ;;  %p262_p4 = pnand %p657_p0, %p261_p1 }
  0x25   : > { %1265 = sst [smem:[#allocation22_spill]] %s1264_s29  ;;  %s1234_s12 = sand.u32 (!%p262_p4), 1, %s913_s25  }
  0x26   : > { %265 = sbr.rel (%p262_p4) target bundleno = 1016 (0x3f8), region = 40  ;;  %s1237_s13 = sand.u32 (!%p262_p4), 1, %s901_s22  }
  0x27   : > { %s1098_s15 = sshll.u32 (!%p262_p4), %s1234_s12, 3  ;;  %s1102_s16 = sshll.u32 (!%p262_p4), %s1237_s13, 3 }
  0x28   : > { %p307_p2 = scmp.lt.s32.totalorder (!%p262_p4), %s925_s28, 1  ;;  %p311_p5 = scmp.lt.s32.totalorder (!%p262_p4), %s921_s27, 3 }
  0x29   : > { %s306_s8 = scalar_lea.vmem (!%p262_p4), [#allocation5], %s1102_s16  ;;  %p664_p6 = scmp.ne.s32.totalorder (!%p262_p4), %s921_s27, 0 }
  0x2b   : > { %s308_s17 = scalar_select %p307_p2, %s925_s28, 1 }
  0x2c   : > { %s312_s19 = scalar_select %p311_p5, %s921_s27, 3 }
  0x2d   : > { %s660_s20 = sshll.u32 %s308_s17, 3  ;;  %s299_s17 = scalar_lea.vmem [#allocation3], %s1098_s15 }
  0x2e   : > { %s310_s9 = scalar_lea.vmem %s1221_s0, %s660_s20  ;;  %s678_s26 = sshll.u32 %s312_s19, 5 }
  0x2f   : > { %s315_s12 = scalar_lea.vmem %s1222_s1, %s678_s26  ;;  %s318_s13 = scalar_lea.vmem %s1223_s2, %s312_s19 }
  0x30   : > { %s663_s18 = sshll.u32 %s312_s19, 3  ;;  %326 = sbr.rel (%p664_p6) target bundleno = 55 (0x37), region = 44 }
  0x31   : > { %s1120_s6 = scalar_lea.vmem %s1224_s3, %s663_s18 }
  0x35   : > { %v781_v0 = vld [vmem:[%s1225_s4] ss:$0 sm:$0xff]  ;;  %vm331_vm0 = vcmask 261120  }
  0x36   : > { %332 = vst.msk [vmem:[#allocation2] sm:$0xff] %vm331_vm0, %v781_v0 }
  0x37 PF: > { %v337_v1 = vld [vmem:[%s315_s12 + $0x18] sm:$0xff]  ;;  %v336_v2 = vld [vmem:[%s315_s12 + $0x10] sm:$0xff]  ;;  %v335_v3 = vld [vmem:[%s315_s12 + $0x8] sm:$0xff]  ;;  %vm342_vm1 = vcmask 261120   ;;  %s939_s21 = smov 120   ;;  %vm369_vm2 = vcmask 64512  }
  0x38   : > { %358 = vmatpush.msra.mxu0 %v337_v1  ;;  %v334_v4 = vld [vmem:[%s315_s12] sm:$0xff]  ;;  %s940_s23 = smov 112   ;;  %p670_p8 = scmp.ne.s32.totalorder %s921_s27, 3 }
  0x39   : > { %v333_v5 = vld [vmem:[%s310_s9] sm:$0xff] }
  0x3a   : > { %359 = vmatpush.msra.mxu0 %v336_v2  ;;  %v782_v6 = vld [vmem:[%s318_s13] ss:$0 sm:$0xff] }
  0x3b   : > { %v446_v30 = vld [vmem:[%s1120_s6] sm:$0xff] }
  0x3c   : > { %360 = vmatpush.msra.mxu0 %v335_v3  ;;  %465 = vmatpush.msra.mxu3 %v446_v30 }
  0x3d   : > { %v445_v32 = vld [vmem:[#allocation2] sm:$0xff] }
  0x3e   : > { %361 = vmatpush.msra.mxu0 %v334_v4 }
  0x3f   : > { %665 = vmatmul.msk.f32.vlgmr.msra.gmra.mxu0 %vm342_vm1, %v333_v5 }
  0xbc   : > { %v363_v7 = vpop.f32.mrf.mxu0 }
  0xbd   : > { %v364_v8 = vadd.f32 %v782_v6, %v363_v7 }
  0xbf   : > { %367 = vrot.lane.b32.xlu0 %v364_v8, %s939_s21 }
 0x131   : > { %v368_v9 = vpop.permute.xlu0 %367 }
 0x132   : > { %666 = vmatpush.xpose.msk.msra.mxu1 %vm369_vm2, %v368_v9 }
 0x135   : > { %667 = vmatmul.msk.f32.vlgmr.msra.gmra.mxu1 %vm369_vm2, %v364_v8 }
 0x1b2   : > { %v391_v10 = vpop.f32.mrf.mxu1 }
 0x1b3   : > { %v394_v11 = vsel %vm369_vm2, %v391_v10, -inf }
 0x1b4   : > { %395 = vmax.xlane.f32.xlu0 %v394_v11 }
 0x227   : > { %v396_v12 = vpop.xlane.xlu0 %395 }
 0x228   : > { %v397_v13 = vsub.f32 %v391_v10, %v396_v12 }
 0x22a   : > { %v398_v14 = vmul.f32 1.442695, %v397_v13 }
 0x22c   : > { %783 = vpow2.f32 %v398_v14 }
 0x232   : > { %v784_v15 = vpop.eup %783 }
 0x233   : > { %v400_v16 = vsel %vm369_vm2, %v784_v15, 0.0 }
 0x234   : > { %401 = vadd.xlane.f32.xlu1 %v400_v16 }
 0x24d   : > { %419 = vrot.lane.b32.xlu1 %v364_v8, %s940_s23 }
 0x2a7   : > { %v402_v17 = vpop.xlane.xlu1 %401 }
 0x2a8   : > { %785 = vrcp.f32 %v402_v17  ;;  %v414_v21 = vand.u32 2147483648, %v402_v17  ;;  %v412_v23 = vand.u32 2147483647, %v402_v17  ;;  %vm408_vm4 = vweird.f32 %v402_v17 }
 0x2aa   : > { %v415_v25 = vor.u32 1.1754944e-38, %v414_v21  ;;  %vm413_vm6 = vcmp.eq.f32.partialorder %v412_v23, 8.507059e+37 }
 0x2ae   : > { %v786_v18 = vpop.eup %785 }
 0x2af   : > { %v404_v19 = vmul.f32 %v786_v18, %v402_v17  ;;  %vm409_vm3 = vweird.f32 %v786_v18 }
 0x2b0   : > { %vm410_vm5 = vmor %vm408_vm4, %vm409_vm3 }
 0x2b1   : > { %v405_v20 = vsub.f32 1.0, %v404_v19 }
 0x2b3   : > { %v406_v22 = vmul.f32 %v786_v18, %v405_v20 }
 0x2b5   : > { %v407_v24 = vadd.f32 %v786_v18, %v406_v22 }
 0x2b7   : > { %v411_v26 = vsel %vm410_vm5, %v786_v18, %v407_v24 }
 0x2b8   : > { %v416_v27 = vsel %vm413_vm6, %v415_v25, %v411_v26 }
 0x2b9   : > { %v417_v28 = vmul.f32 %v784_v15, %v416_v27 }
 0x2bb   : > { %418 = vst.msk [vmem:[%s306_s8] sm:$0xff] %vm369_vm2, %v417_v28 }
 0x2bf   : > { %v420_v29 = vpop.permute.xlu1 %419 }
 0x2c0   : > { %440 = vmatpush.msra.mxu2 %v420_v29 }
 0x2c1   : > { %668 = vmatmul.msk.f32.vlgmr.msra.gmra.mxu2 %vm369_vm2, %v417_v28 }
 0x344   : > { %v442_v31 = vpop.f32.mrf.mxu2 }
 0x345   : > { %669 = vmatmul.msk.f32.vlgmr.msra.gmra.mxu3 %vm369_vm2, %v442_v31 }
 0x3c7   : > { %475 = sbr.rel (%p670_p8) target bundleno = 980 (0x3d4), region = 48 }
 0x3c8   : > { %v467_v33 = vpop.f32.mrf.mxu3 }
 0x3c9   : > { %v470_v34 = vadd.f32 %v467_v33, %v445_v32 }
 0x3cb   : > { %471 = vst.msk [vmem:[#allocation2] sm:$0xff] %vm342_vm1, %v470_v34 }
 0x3d2   : > { %v476_v35 = vld [vmem:[#allocation2] sm:$0xff] }
 0x3d3   : > { %477 = vst.msk [vmem:[%s299_s17] sm:$0xff] %vm342_vm1, %v476_v35 }
 0x3d4 PF: > { %s673_s6 = sshll.u32 %s925_s28, 3  ;;  %s496_s7 = sshll.u32 %s299_s17, 4  ;;  %s497_s7 = int_to_ptr.vmem [resolvable:$true] %s496_s7 }
 0x3d5   : > { %s494_s29 = scalar_lea.hbm %s1226_s5, %s673_s6  ;;  %s1266_s18 = sand.u32 1, %s913_s25  }
 0x3d6   : > { %s498_s10 = sshll.u32 %s494_s29, 4  ;;  %s479_s9 = scalar_lea.sflag [#allocation4], %s1266_s18  ;;  %s499_s10 = int_to_ptr.hbm [resolvable:$true] %s498_s10 }
 0x3d7   : > { %s801_s12 = sshra.s32 %s499_s10, 4  ;;  %s807_s30 = scalar_lea.hbm %s1226_s5, 16  ;;  %s802_s12 = int_to_ptr.hbm [resolvable:$true] %s801_s12 }
 0x3d8   : > { %s803_s13 = scalar_lea.hbm %s802_s12, 8  ;;  %p808_p0 = scmp.lt.s32.totalorder %s802_s12, %s1226_s5 }
 0x3d9   : > { %p804_p9 = scmp.ne.s32.totalorder %s802_s12, %s803_s13  ;;  %p809_p1 = scmp.lt.s32.totalorder %s807_s30, %s803_s13 }
 0x3db   : > { %p805_p10 = pnand %p804_p9, %p1047_p3  ;;  %p810_p4 = por %p809_p1, %p808_p0 }
 0x3dd   : > { %p806_p11 = pneg %p805_p10 }
 0x3df   : > { %p811_p2 = pnand %p810_p4, %p806_p11 }
 0x3e1   : > { %814 = shalt.err (!%p811_p2)
}
 0x3e2   : > { %679 = dma.vmem_to_hbm [thread:$0]  (%p1047_p3), %s497_s7, 128, %s499_s10, %s479_s9  }
 0x3e3   : > { %s674_s17 = sshll.u32 %s925_s28, 2  ;;  %s512_s23 = sshll.u32 %s306_s8, 4  ;;  %s513_s23 = int_to_ptr.vmem [resolvable:$true] %s512_s23 }
 0x3e4   : > { %s508_s6 = sadd.s32 %s921_s27, %s674_s17  ;;  %s1268_s18 = sld [smem:[#allocation23_spill]] }
 0x3e5   : > { %s675_s24 = sshll.u32 %s508_s6, 3  ;;  %s1269_s19 = sand.u32 1, %s901_s22  }
 0x3e6   : > { %s484_s14 = scalar_lea.sflag [#allocation6], %s1269_s19 }
 0x3ea   : > { %s510_s12 = scalar_lea.hbm %s1268_s18, %s675_s24  ;;  %s835_s27 = scalar_lea.hbm %s1268_s18, 64 }
 0x3eb   : > { %s514_s13 = sshll.u32 %s510_s12, 4  ;;  %s515_s13 = int_to_ptr.hbm [resolvable:$true] %s514_s13 }
 0x3ec   : > { %s829_s20 = sshra.s32 %s515_s13, 4  ;;  %s830_s20 = int_to_ptr.hbm [resolvable:$true] %s829_s20 }
 0x3ed   : > { %s831_s30 = scalar_lea.hbm %s830_s20, 8  ;;  %p836_p8 = scmp.lt.s32.totalorder %s830_s20, %s1268_s18 }
 0x3ee   : > { %p832_p5 = scmp.ne.s32.totalorder %s830_s20, %s831_s30  ;;  %p837_p9 = scmp.lt.s32.totalorder %s835_s27, %s831_s30 }
 0x3f0   : > { %p833_p3 = pnand %p832_p5, %p1076_p12  ;;  %p838_p10 = por %p837_p9, %p836_p8 }
 0x3f2   : > { %p834_p6 = pneg %p833_p3 }
 0x3f4   : > { %p839_p11 = pnand %p838_p10, %p834_p6 }
 0x3f6   : > { %842 = shalt.err (!%p839_p11)
}
 0x3f7   : > { %680 = dma.vmem_to_hbm [thread:$0]  (%p1076_p12), %s513_s23, 128, %s515_s13, %s484_s14  }
 0x3f8 PF: > { %s1270_s10 = sld [smem:[#allocation15_spill]] }
 0x3f9   : > { %s1271_s9 = sld [smem:[#allocation11_spill]] }
 0x3fe   : > { %p690_p0 = scmp.ge.s32.totalorder %s1270_s10, 2 }
 0x3ff   : > { %s526_s21 = sand.u32 1, %s1271_s9  }
 0x400   : > { %p684_p1 = pnand %p690_p0, %p1064_p7  ;;  %s527_s17 = scalar_lea.sflag [#allocation4], %s526_s21 }
 0x402   : > { %p685_p4 = pneg %p684_p1 }
 0x404   : > { %888 = dma.done.wait (%p685_p4), %s527_s17, 128  }
 0x405   : > { %890 = vsyncadd (%p685_p4), %s527_s17, 4294967168  ;;  %s1273_s6 = sld [smem:[#allocation9_spill]]  ;;  %p687_p2 = pnand %p690_p0, %p1088_p13 }
 0x407   : > { %p688_p5 = pneg %p687_p2 }
 0x40b   : > { %s536_s26 = sand.u32 1, %s1273_s6  }
 0x40c   : > { %s537_s15 = scalar_lea.sflag [#allocation6], %s536_s26 }
 0x40d   : > { %892 = dma.done.wait (%p688_p5), %s537_s15, 128  }
 0x40e   : > { %894 = vsyncadd (%p688_p5), %s537_s15, 4294967168  ;;  %s23_s7 = sadd.s32 1, %s1270_s10   ;;  %s1275_s23 = sld [smem:[#allocation10_spill]] }
 0x40f   : > { %p20_p12 = scmp.ge.s32.totalorder %s23_s7, 10   ;;  %s1276_s29 = sld [smem:[#allocation21_spill]] }
 0x410   : > { %s1277_s12 = sld [smem:[#allocation12_spill]]  ;;  %s1283_s21 = smov %s901_s22 }
 0x411   : > { %s1278_s26 = sld [smem:[#allocation20_spill]]  ;;  %s1286_s24 = smov %s913_s25 }
 0x412   : > { %s1279_s27 = sld [smem:[#allocation13_spill]] }
 0x413   : > { %s1280_s28 = sld [smem:[#allocation14_spill]] }
 0x414   : > { %s1281_s13 = sld [smem:[#allocation16_spill]]  ;;  %s1284_s22 = smov %s1275_s23 }
 0x415   : > { %s1282_s30 = sld [smem:[#allocation17_spill]]  ;;  %s1285_s23 = smov %s1276_s29 }
 0x416   : > { %s1287_s25 = smov %s1277_s12  ;;  %22 = sbr.rel (!%p20_p12) target bundleno = 11 (0xb), region = 109 }
 0x41a   : > { %s1288_s29 = smov %s1281_s13 }
 0x41b   :  { %543 = vsyncpa [#allocation4], 1 }
 0x41c   :  { %545 = vsyncpa [#allocation4 + $0x1], 1 }
 0x41d   :  { %546 = vsyncpa [#allocation6], 1 }
 0x41e   :  { %548 = vsyncpa [#allocation6 + $0x1], 1 }

</bundles_post_ra>
